<compile_context>
chip_gen: v7x
topology: tpu7x:2x2x1
jax: 0.10.0
libtpu: 0.0.40
codegen_flags: <defaults>
</compile_context>

<pallas_src>
import functools

import jax
import jax.numpy as jnp
from jax import lax
from jax.experimental import pallas as pl
from jax.experimental.pallas import tpu as pltpu


def _round_up(v, m):
    return ((v + m - 1) // m) * m


# ---------------------------------------------------------------------------
# Kernel 1: streaming pass over samples (grid over N blocks, "parallel").
# Per block it emits two tiny partial reductions:
#   psum[i] = sum over rows of the x tile                    -> (1, 1, D)
#   pssq[i] = sum over rows of (x_tile @ W1_masked)**2       -> (1, 1, H)
# W1_masked has row `col` zeroed in the wrapper, so the intervened column
# needs no in-kernel mask (a constant column contributes nothing to the
# centered data; its effect on the mean is added back in the finalize kernel).
# ---------------------------------------------------------------------------
def _rnnace_stream_kernel(x_ref, w1m_ref, psum_ref, pssq_ref):
    x = x_ref[...]                                          # (TILE_N, D) f32
    psum_ref[...] = jnp.sum(x, axis=0)[None, None, :]       # (1, 1, D)
    # bf16 only at the MXU; accumulation stays f32.
    y = jnp.dot(x.astype(jnp.bfloat16), w1m_ref[...],
                preferred_element_type=jnp.float32)         # (TILE_N, H)
    pssq_ref[...] = jnp.sum(y * y, axis=0)[None, None, :]   # (1, 1, H)


# ---------------------------------------------------------------------------
# Kernel 2: finalize (runs once): reduce partials, head forward at the
# intervened mean, analytic Hessian-trace correction.
# ---------------------------------------------------------------------------
def _rnnace_finalize_kernel(psum_ref, pssq_ref, w1m_ref, w1col_ref, b1_ref,
                            w2t_ref, b2_ref, out_ref, *,
                            n, output_idx, alpha):
    inv_n = 1.0 / n
    mu = jnp.sum(psum_ref[...], axis=0, keepdims=True) * inv_n      # (1, D)
    ssq = jnp.sum(pssq_ref[...], axis=0, keepdims=True)             # (1, H)

    # Same bf16-rounded masked W1 that the streaming matmul used, so the
    # (ssq - n*g^2) cancellation is consistent with the streamed Y.
    w1m = w1m_ref[...].astype(jnp.float32)                          # (D, H)
    g = jnp.dot(mu, w1m, preferred_element_type=jnp.float32)        # (1, H)

    # Predictor forward at the intervened mean (task == 'regression').
    # mu_full @ W1 = mu_raw @ W1_masked + alpha * W1[col, :]
    # TODO(synk): 'binary' (sigmoid) / 'classification' (softmax) heads change
    # the Hessian closed form and are not implemented here.
    z = g + jnp.float32(alpha) * w1col_ref[...] + b1_ref[...]       # (1, H)
    a = jnp.tanh(z)
    pred = lax.dot_general(a, w2t_ref[...], (((1,), (1,)), ((), ())),
                           preferred_element_type=jnp.float32) + b2_ref[...]
    pk = pred[:, output_idx:output_idx + 1]                         # (1, 1)

    wk = w2t_ref[output_idx:output_idx + 1, :]                      # (1, H)
    # d^2 tanh(u)/du^2 = -2 * a * (1 - a^2);   H = W1 diag(c) W1^T
    c = wk * (-2.0) * a * (1.0 - a * a)                             # (1, H)

    # sum(H ∘ Cov) = (1/(n-1)) * Σ_h c_h * (ssq_h - n * g_h^2)
    trace_term = jnp.sum(c * (ssq - jnp.float32(n) * g * g)) * (1.0 / (n - 1))
    out_ref[...] = pk + 0.5 * trace_term


# ---------------------------------------------------------------------------
# Wrapper
# ---------------------------------------------------------------------------
def rnn_ace_forward(x, t, feature_idx, output_idx, alpha, params, *,
                    tile_n=None):
    """x: (N, T, F) float32; t/feature_idx/output_idx static ints; alpha float."""
    n, tt, f = x.shape
    assert n >= 2, "covariance (ddof=1) needs at least 2 samples"
    d = (t + 1) * f
    col = t * f + feature_idx

    w1, b1, w2, b2 = params
    h = w1.shape[1]
    cdim = w2.shape[1]

    # Only timesteps 0..t are used -> slice BEFORE the kernel so the streaming
    # pass never DMAs the unused (T-t-1)*F columns out of HBM.
    xs = jnp.reshape(x[:, :t + 1, :].astype(jnp.float32), (n, d))

    # Tile over samples: multiple of 8 sublanes, ~4 MiB/buffer cap (fits the
    # default scoped VMEM on v5e and double-buffers comfortably under v7x's
    # 64 MiB physical VMEM).
    if tile_n is None:
        tile_n = max(8, min(1024, (4 << 20) // max(4 * d, 1)))
    tile_n = max(8, _round_up(min(tile_n, _round_up(n, 8)), 8))
    n_pad = _round_up(n, tile_n)
    if n_pad != n:
        # Zero rows contribute 0 to both partial sums; true n is used below.
        xs = jnp.concatenate(
            [xs, jnp.zeros((n_pad - n, d), jnp.float32)], axis=0)
    g_blocks = n_pad // tile_n

    # Fold the intervention do(x[:, t, feature_idx] = alpha) into the weights:
    # zero row `col` of W1 so the streaming matmul sees the intervened column
    # removed; its constant (=alpha) effect on the mean is restored at finalize.
    w1col = w1[col:col + 1, :].astype(jnp.float32)                  # (1, H)
    w1m = w1.at[col, :].set(0.0).astype(jnp.bfloat16)               # (D, H) bf16
    w2t = jnp.transpose(w2).astype(jnp.float32)                     # (C, H)

    stream_flops = 2 * n_pad * d * h + 3 * n_pad * h + n_pad * d
    stream_bytes = 4 * n_pad * d + 2 * d * h + 4 * g_blocks * (d + h)
    vmem_bytes = int(1.5 * (2 * tile_n * d * 4        # double-buffered x tile
                            + 2 * d * h * 2           # W1 (bf16)
                            + 4 * (d + h) * 2)) + (2 << 20)
    vmem_bytes = min(max(vmem_bytes, 4 << 20), 48 << 20)

    psum, pssq = pl.pallas_call(
        _rnnace_stream_kernel,
        grid=(g_blocks,),
        in_specs=[
            pl.BlockSpec((tile_n, d), lambda i: (i, 0)),
            pl.BlockSpec((d, h), lambda i: (0, 0)),
        ],
        out_specs=[
            pl.BlockSpec((1, 1, d), lambda i: (i, 0, 0)),
            pl.BlockSpec((1, 1, h), lambda i: (i, 0, 0)),
        ],
        out_shape=[
            jax.ShapeDtypeStruct((g_blocks, 1, d), jnp.float32),
            jax.ShapeDtypeStruct((g_blocks, 1, h), jnp.float32),
        ],
        compiler_params=pltpu.CompilerParams(
            dimension_semantics=("parallel",),      # shards across v7x's 2 TCs
            vmem_limit_bytes=vmem_bytes),
        cost_estimate=pl.CostEstimate(flops=stream_flops, transcendentals=0,
                                      bytes_accessed=stream_bytes),
    )(xs, w1m)

    psum2 = jnp.reshape(psum, (g_blocks, d))
    pssq2 = jnp.reshape(pssq, (g_blocks, h))

    fin_kernel = functools.partial(_rnnace_finalize_kernel, n=n,
                                   output_idx=int(output_idx),
                                   alpha=float(alpha))
    fin_flops = 2 * d * h + 2 * h * cdim + 12 * h + 2 * g_blocks * (d + h)
    fin_bytes = 4 * (g_blocks * (d + h) + h + cdim * h + cdim + 1) + 2 * d * h

    vmem_specs = [pl.BlockSpec(memory_space=pltpu.MemorySpace.VMEM)
                  for _ in range(7)]
    effect = pl.pallas_call(
        fin_kernel,
        in_specs=vmem_specs,
        out_specs=pl.BlockSpec(memory_space=pltpu.MemorySpace.VMEM),
        out_shape=jax.ShapeDtypeStruct((1, 1), jnp.float32),
        compiler_params=pltpu.CompilerParams(vmem_limit_bytes=16 << 20),
        cost_estimate=pl.CostEstimate(flops=fin_flops, transcendentals=h,
                                      bytes_accessed=fin_bytes),
    )(psum2, pssq2, w1m, w1col, b1.astype(jnp.float32),
      w2t, b2.astype(jnp.float32))
    return effect[0, 0]


# ---------------------------------------------------------------------------
# Pure-JAX reference (uses jax.hessian, mirrors torch.autograd.grad nesting)
# ---------------------------------------------------------------------------
def reference_effect(x, t, feature_idx, output_idx, alpha, params):
    w1, b1, w2, b2 = params
    xi = x[:, :t + 1, :]
    xi = xi.at[:, t, feature_idx].set(alpha)
    n = xi.shape[0]
    xflat = xi.reshape(n, -1)
    mu = jnp.mean(xflat, axis=0)
    xc = xflat - mu
    cov = jnp.matmul(xc.T, xc, precision="highest") / (n - 1)

    def fk(z):
        a = jnp.tanh(jnp.matmul(z, w1, precision="highest") + b1[0])
        return (jnp.matmul(a, w2, precision="highest") + b2[0])[output_idx]

    hess = jax.hessian(fk)(mu)
    return fk(mu) + 0.5 * jnp.sum(hess * cov)


if __name__ == "__main__":
    key = jax.random.PRNGKey(0)
    k_x, k_w1, k_b1, k_w2, k_b2 = jax.random.split(key, 5)

    N, T, F = 32, 8, 4          # samples, timesteps, features
    t, feature_idx, output_idx, alpha = 5, 2, 1, 0.7
    D = (t + 1) * F             # flattened intervened dimension
    H, C = 32, 3                # predictor hidden size / number of outputs

    x = jax.random.normal(k_x, (N, T, F), dtype=jnp.float32)
    params = (
        0.3 * jax.random.normal(k_w1, (D, H), dtype=jnp.float32),
        0.1 * jax.random.normal(k_b1, (1, H), dtype=jnp.float32),
        0.3 * jax.random.normal(k_w2, (H, C), dtype=jnp.float32),
        0.1 * jax.random.normal(k_b2, (1, C), dtype=jnp.float32),
    )

    # tile_n=8 -> 4-step grid, exercises the pipelined/parallel streaming path.
    effect = rnn_ace_forward(x, t, feature_idx, output_idx, alpha, params,
                             tile_n=8)
    effect = jax.block_until_ready(effect)

    ref = jax.block_until_ready(
        reference_effect(x, t, feature_idx, output_idx, alpha, params))

    # bf16 at the MXU loosens agreement slightly vs the f32 reference.
    assert jnp.allclose(effect, ref, rtol=1e-2, atol=1e-2), (effect, ref)
    print("KERNEL_OK")
</pallas_src>

<mosaic_0001>
module attributes {stable_mosaic.version = 11 : i64} {
  func.func @_rnnace_stream_kernel(%arg0: i32, %arg1: memref<8x24xf32, #tpu.memory_space<vmem>>, %arg2: memref<24x32xbf16, #tpu.memory_space<vmem>>, %arg3: memref<1x1x24xf32, #tpu.memory_space<vmem>>, %arg4: memref<1x1x32xf32, #tpu.memory_space<vmem>>) attributes {dimension_semantics = [#tpu.dimension_semantics<parallel>], iteration_bounds = array<i64: 4>, scalar_prefetch = 0 : i64, scratch_operands = 0 : i64, tpu.core_type = #tpu.core_type<tc>, window_params = [{transform_indices = @transform_0, window_bounds = array<i64: 8, 24>}, {pipeline_mode = #tpu.pipeline_mode<synchronous>, transform_indices = @transform_1, window_bounds = array<i64: 24, 32>}, {transform_indices = @transform_2, window_bounds = array<i64: 1, 1, 24>}, {transform_indices = @transform_3, window_bounds = array<i64: 1, 1, 32>}]} {
    %c0 = arith.constant 0 : index
    %c0_0 = arith.constant 0 : index
    %0 = vector.load %arg1[%c0, %c0_0] : memref<8x24xf32, #tpu.memory_space<vmem>>, vector<8x24xf32>
    %cst = arith.constant dense<0.000000e+00> : vector<24xf32>
    %1 = vector.multi_reduction <add>, %0, %cst [0] : vector<8x24xf32> to vector<24xf32>
    %2 = vector.shape_cast %1 : vector<24xf32> to vector<1x1x24xf32>
    %c0_1 = arith.constant 0 : index
    %c0_2 = arith.constant 0 : index
    %c0_3 = arith.constant 0 : index
    %3 = vector.load %arg3[%c0_1, %c0_2, %c0_3] : memref<1x1x24xf32, #tpu.memory_space<vmem>>, vector<1x1x24xf32>
    tpu.vector_store %arg3[%c0_1, %c0_2, %c0_3], %2 {strides = array<i32>} : memref<1x1x24xf32, #tpu.memory_space<vmem>>, vector<1x1x24xf32>,
    %4 = arith.truncf %0 : vector<8x24xf32> to vector<8x24xbf16>
    %c0_4 = arith.constant 0 : index
    %c0_5 = arith.constant 0 : index
    %5 = vector.load %arg2[%c0_4, %c0_5] : memref<24x32xbf16, #tpu.memory_space<vmem>>, vector<24x32xbf16>
    %cst_6 = arith.constant dense<0.000000e+00> : vector<8x32xf32>
    %6 = tpu.matmul %4, %5, %cst_6 {dimension_numbers = #tpu.dot_dimension_numbers<[1], [0], [0], [1], [0, 0, 1, 1], [], []>} : vector<8x24xbf16>, vector<24x32xbf16>, vector<8x32xf32> -> vector<8x32xf32>
    %7 = arith.mulf %6, %6 : vector<8x32xf32>
    %cst_7 = arith.constant dense<0.000000e+00> : vector<32xf32>
    %8 = vector.multi_reduction <add>, %7, %cst_7 [0] : vector<8x32xf32> to vector<32xf32>
    %9 = vector.shape_cast %8 : vector<32xf32> to vector<1x1x32xf32>
    %c0_8 = arith.constant 0 : index
    %c0_9 = arith.constant 0 : index
    %c0_10 = arith.constant 0 : index
    %10 = vector.load %arg4[%c0_8, %c0_9, %c0_10] : memref<1x1x32xf32, #tpu.memory_space<vmem>>, vector<1x1x32xf32>
    tpu.vector_store %arg4[%c0_8, %c0_9, %c0_10], %9 {strides = array<i32>} : memref<1x1x32xf32, #tpu.memory_space<vmem>>, vector<1x1x32xf32>,
    return
  }
  func.func @transform_0(%arg0: i32) -> (i32, i32) {
    %c0_i32 = arith.constant 0 : i32
    %c0_i32_0 = arith.constant 0 : i32
    return %arg0, %c0_i32 : i32, i32
  }
  func.func @transform_1(%arg0: i32) -> (i32, i32) {
    %c0_i32 = arith.constant 0 : i32
    %c0_i32_0 = arith.constant 0 : i32
    %c0_i32_1 = arith.constant 0 : i32
    return %c0_i32, %c0_i32_0 : i32, i32
  }
  func.func @transform_2(%arg0: i32) -> (i32, i32, i32) {
    %c0_i32 = arith.constant 0 : i32
    %c0_i32_0 = arith.constant 0 : i32
    %c0_i32_1 = arith.constant 0 : i32
    return %arg0, %c0_i32, %c0_i32_0 : i32, i32, i32
  }
  func.func @transform_3(%arg0: i32) -> (i32, i32, i32) {
    %c0_i32 = arith.constant 0 : i32
    %c0_i32_0 = arith.constant 0 : i32
    %c0_i32_1 = arith.constant 0 : i32
    return %arg0, %c0_i32, %c0_i32_0 : i32, i32, i32
  }
}

</mosaic_0001>

<bundles_post_ra>
// kernel: tpu_custom_call.1
= control target key start
LH: loop header
LB: loop body
LE: loop exit
PB: predicated region body
PF: predicated region fallthrough
CT: control target
= control target key end

     0   :  { %9 = vsyncpa [#allocation3], 0  ;;  %s700_s0 = inlined_call_operand.vmem [shape: f32[32,24], index: 0, kind: input, shape index: {}]   ;;  %s701_s1 = inlined_call_operand.vmem [shape: bf16[24,32], index: 1, kind: input, shape index: {}]   ;;  %s702_s2 = inlined_call_operand.hbm [shape: f32[4,1,24], index: 2, kind: output, shape index: {0}]   ;;  %s703_s3 = inlined_call_operand.hbm [shape: f32[4,1,32], index: 3, kind: output, shape index: {1}]  }
   0x1   :  { %11 = vsyncpa [#allocation3 + $0x1], 0 }
   0x2   :  { %12 = vsyncpa [#allocation5], 0 }
   0x3   :  { %14 = vsyncpa [#allocation5 + $0x1], 0  ;;  %s562_s12 = smov 0   ;;  %s564_s13 = smov 0  }
   0x4   :  { %s566_s14 = smov 0   ;;  %s568_s15 = smov 0  }
   0x5 LB: > { %s583_s16 = sadd.s32 4294967295, %s536_s15   ;;  %s371_s17 = sadd.s32 4294967294, %s536_s15   ;;  %s536_s15 = sphi %s568_s15, %s709_s15   ;;  %s532_s14 = sphi %s566_s14, %s708_s14   ;;  %s528_s13 = sphi %s564_s13, %s707_s13   ;;  %s524_s12 = sphi %s562_s12, %s706_s12  }
   0x6   : > { %s587_s18 = sadd.s32 1, %s536_s15   ;;  %s74_s19 = sadd.s32 1, %s532_s14 }
   0x7   : > { %s71_s20 = ssub.s32 %s536_s15, %s587_s18  ;;  %p84_p0 = scmp.ne.s32.totalorder %s532_s14, %s528_s13 }
   0x8   : > { %p72_p1 = scmp.eq.s32.totalorder %s71_s20, 0  ;;  %p85_p2 = scmp.eq.s32.totalorder %s583_s16, 3 }
   0x9   : > { %p90_p3 = scmp.ne.s32.totalorder %s528_s13, %s524_s12  ;;  %p91_p4 = scmp.eq.s32.totalorder %s371_s17, 3 }
   0xa   : > { %s598_s21 = scalar_select %p72_p1, %s532_s14, %s74_s19  }
   0xb   : > { %p600_p5 = por %p85_p2, %p84_p0  ;;  %p604_p6 = por %p91_p4, %p90_p3 }
   0xc   : > { %p374_p7 = scmp.ge.s32.totalorder %s536_s15, 1  ;;  %p145_p8 = scmp.lt.s32.totalorder %s536_s15, 5 }
   0xe   : > { %p146_p9 = pnand %p374_p7, %p145_p8 }
   0xf   : > { %v440_v0 = vld [vmem:[%s701_s1] sm:$0xff] (!%p146_p9)   ;;  %v538_v1 = vmov (!%p146_p9), 0.0   ;;  %v441_v2 = vld [vmem:[%s701_s1 + $0x8] ss:$0 sps:$4 sm:$0xff] (!%p146_p9)   ;;  %vm203_vm0 = vcmask (!%p146_p9), 1043456   ;;  %vm539_vm1 = vmmov (!%p146_p9), 0  }
  0x10   : > { %149 = sbr.rel (%p146_p9) target bundleno = 271 (0x10f), region = 28  ;;  %386 = vmatprep.subr.bf16.mxu0 (!%p146_p9), %v538_v1  ;;  %390 = vmatprep.mubr.msk.bf16.mxu0 (!%p146_p9), %vm539_vm1, %v538_v1  ;;  %p171_p10 = scmp.lt.s32.totalorder (!%p146_p9), %s583_s16, 3  ;;  %v205_v3 = vsel (!%p146_p9), %vm203_vm0, %v441_v2, 0  ;;  %vm177_vm2 = vcmask (!%p146_p9), 195584   ;;  %vm185_vm3 = vcmask (!%p146_p9), 188416  }
  0x11   : > { %387 = vmatpush3.bf16.msra.mxu0 (!%p146_p9), %v440_v0  ;;  %s622_s6 = sand.u32 (!%p146_p9), 1, %s528_s13   ;;  %s379_s7 = sshll.u32 (!%p146_p9), %s583_s16, 4 }
  0x12   : > { %388 = vmatprep.subr.bf16.mxu0 (!%p146_p9), %v538_v1  ;;  %s164_s8 = scalar_lea.vmem (!%p146_p9), [#allocation2], %s622_s6  ;;  %s631_s17 = scalar_lea.hbm (!%p146_p9), %s702_s2, %s379_s7 }
  0x13   : > { %s275_s9 = sshll.u32 (!%p146_p9), %s164_s8, 4  ;;  %s259_s19 = scalar_lea.sflag (!%p146_p9), [#allocation3], %s622_s6  ;;  %s276_s9 = int_to_ptr.vmem [resolvable:$true] %s275_s9 }
  0x14   : > { %s442_s20 = scalar_lea.vmem (!%p146_p9), %s276_s9, 16  ;;  %s540_s24 = smov (!%p146_p9), [#allocation2]  }
  0x15   : > { %389 = vmatpush3.bf16.msra.mxu0 (!%p146_p9), %v205_v3  ;;  %p443_p11 = scmp.ne.s32.totalorder (!%p146_p9), %s276_s9, %s442_s20  ;;  %s446_s25 = sshll.u32 (!%p146_p9), %s540_s24, 4  ;;  %s447_s25 = int_to_ptr.vmem [resolvable:$false] %s446_s25 }
  0x16   : > { %s448_s26 = scalar_lea.vmem (!%p146_p9), %s447_s25, 32  ;;  %p449_p0 = scmp.lt.s32.totalorder (!%p146_p9), %s276_s9, %s447_s25 }
  0x17   : > { %s172_s28 = scalar_select %p171_p10, %s583_s16, 3 }
  0x18   : > { %p444_p12 = pnand %p443_p11, %p600_p5  ;;  %p450_p1 = scmp.lt.s32.totalorder %s448_s26, %s442_s20 }
  0x19   : > { %s375_s29 = sshll.u32 %s172_s28, 3 }
  0x1a   : > { %s174_s5 = scalar_lea.vmem %s700_s0, %s375_s29  ;;  %p445_p13 = pneg %p444_p12 }
  0x1b   : > { %v176_v4 = vld [vmem:[%s174_s5] sm:$0xff]  ;;  %p451_p2 = por %p450_p1, %p449_p0 }
  0x1c   : > { %v178_v5 = vsel %vm177_vm2, %v176_v4, 0.0  ;;  %v187_v6 = vpack.c.bf16 %v176_v4, %v176_v4 }
  0x1d   : > { %v179_v7 = vrot.slane %v178_v5, 4  ;;  %p452_p3 = pnand %p451_p2, %p445_p13 }
  0x1e   : > { %391 = vmatmul.mubr.msk.bf16.vlgmr.msra.gmra.mrb[0].mxu0 %vm177_vm2, %v187_v6 }
  0x1f   : > { %v180_v8 = vadd.f32 %v179_v7, %v178_v5 }
  0x21   : > { %v181_v9 = vrot.slane %v180_v8, 2 }
  0x23   : > { %v182_v10 = vadd.f32 %v181_v9, %v180_v8 }
  0x25   : > { %v183_v11 = vrot.slane %v182_v10, 1 }
  0x27   : > { %v184_v12 = vadd.f32 %v183_v11, %v182_v10 }
  0x29   : > { %186 = vst.msk [vmem:[%s164_s8] sm:$0x1] %vm185_vm3, %v184_v12 }
  0x2a   : > { %455 = shalt.err (!%p452_p3)
}
  0x2b   : > { %s456_s27 = scalar_lea.hbm %s631_s17, 16  ;;  %s460_s30 = scalar_lea.hbm %s702_s2, 64 }
  0x2c   : > { %p457_p4 = scmp.ne.s32.totalorder %s631_s17, %s456_s27  ;;  %p461_p9 = scmp.lt.u32.totalorder %s631_s17, %s702_s2 }
  0x2d   : > { %p462_p10 = scmp.lt.u32.totalorder %s460_s30, %s456_s27  ;;  %p464_p12 = scmp.lt.u32.totalorder %s456_s27, %s631_s17 }
  0x2e   : > { %p458_p7 = pnand %p457_p4, %p600_p5 }
  0x2f   : > { %p463_p11 = por %p462_p10, %p461_p9 }
  0x30   : > { %p459_p8 = pneg %p458_p7 }
  0x31   : > { %p465_p13 = por %p464_p12, %p463_p11 }
  0x33   : > { %p466_p0 = pnand %p465_p13, %p459_p8 }
  0x35   : > { %469 = shalt.err (!%p466_p0)
}
  0x36   : > { %394 = dma.vmem_to_hbm [thread:$0]  (%p600_p5), %s276_s9, 16, %s631_s17, %s259_s19   ;;  %vm248_vm4 = vcmask 261120   ;;  %vm256_vm5 = vcmask 253952  }
  0x37   : > { %s170_s8 = scalar_lea.vmem [#allocation4], %s622_s6  ;;  %s657_s17 = scalar_lea.hbm %s703_s3, %s379_s7 }
  0x38   : > { %s288_s10 = sshll.u32 %s170_s8, 4  ;;  %s263_s19 = scalar_lea.sflag [#allocation5], %s622_s6  ;;  %s659_s10 = int_to_ptr.vmem [resolvable:$true] %s288_s10 }
  0x39   : > { %s470_s20 = scalar_lea.vmem %s659_s10, 16  ;;  %s541_s24 = smov [#allocation4]  }
  0x3a   : > { %p471_p1 = scmp.ne.s32.totalorder %s659_s10, %s470_s20  ;;  %s474_s25 = sshll.u32 %s541_s24, 4  ;;  %s475_s25 = int_to_ptr.vmem [resolvable:$false] %s474_s25 }
  0x3b   : > { %s476_s16 = scalar_lea.vmem %s475_s25, 32  ;;  %p477_p4 = scmp.lt.s32.totalorder %s659_s10, %s475_s25 }
  0x3c   : > { %p472_p2 = pnand %p471_p1, %p600_p5  ;;  %p478_p7 = scmp.lt.s32.totalorder %s476_s16, %s470_s20 }
  0x3e   : > { %p473_p3 = pneg %p472_p2  ;;  %p479_p8 = por %p478_p7, %p477_p4 }
  0x40   : > { %p480_p9 = pnand %p479_p8, %p473_p3 }
  0xf1   : > { %v241_v13 = vpop.f32.mrb[0].mxu0 }
  0xf2   : > { %v247_v14 = vmul.f32 %v241_v13, %v241_v13  ;;  %v392_v15 = vpop.f32.mrb[1].mxu0 }
  0xf3   : > { %v244_v16 = vpop.f32.mrb[2].mxu0 }
  0xf4   : > { %v249_v17 = vsel %vm248_vm4, %v247_v14, 0.0  ;;  %v393_v18 = vpop.f32.mrb[3].mxu0 }
  0xf5   : > { %v250_v19 = vrot.slane %v249_v17, 4 }
  0xf7   : > { %v251_v20 = vadd.f32 %v250_v19, %v249_v17 }
  0xf9   : > { %v252_v21 = vrot.slane %v251_v20, 2 }
  0xfb   : > { %v253_v22 = vadd.f32 %v252_v21, %v251_v20 }
  0xfd   : > { %v254_v23 = vrot.slane %v253_v22, 1 }
  0xff   : > { %v255_v24 = vadd.f32 %v254_v23, %v253_v22 }
 0x101   : > { %257 = vst.msk [vmem:[%s170_s8] sm:$0x1] %vm256_vm5, %v255_v24 }
 0x102   : > { %483 = shalt.err (!%p480_p9)
}
 0x103   : > { %s484_s6 = scalar_lea.hbm %s657_s17, 16  ;;  %s488_s27 = scalar_lea.hbm %s703_s3, 64 }
 0x104   : > { %p485_p10 = scmp.ne.s32.totalorder %s657_s17, %s484_s6  ;;  %p489_p13 = scmp.lt.u32.totalorder %s657_s17, %s703_s3 }
 0x105   : > { %p490_p0 = scmp.lt.u32.totalorder %s488_s27, %s484_s6  ;;  %p492_p2 = scmp.lt.u32.totalorder %s484_s6, %s657_s17 }
 0x106   : > { %p486_p11 = pnand %p485_p10, %p600_p5 }
 0x107   : > { %p491_p1 = por %p490_p0, %p489_p13 }
 0x108   : > { %p487_p12 = pneg %p486_p11 }
 0x109   : > { %p493_p3 = por %p492_p2, %p491_p1 }
 0x10b   : > { %p494_p4 = pnand %p493_p3, %p487_p12 }
 0x10d   : > { %497 = shalt.err (!%p494_p4)
}
 0x10e   : > { %395 = dma.vmem_to_hbm [thread:$0]  (%p600_p5), %s659_s10, 16, %s657_s17, %s263_s19  }
 0x10f PF: > { %p405_p7 = scmp.ge.s32.totalorder %s536_s15, 2  ;;  %s300_s30 = sand.u32 1, %s524_s12  }
 0x110   : > { %s301_s4 = scalar_lea.sflag [#allocation3], %s300_s30 }
 0x111   : > { %p399_p8 = pnand %p405_p7, %p604_p6 }
 0x113   : > { %515 = dma.done.wait (!%p399_p8), %s301_s4, 16  }
 0x114   : > { %517 = vsyncadd (!%p399_p8), %s301_s4, 4294967280  ;;  %s309_s5 = scalar_lea.sflag [#allocation5], %s300_s30 }
 0x115   : > { %519 = dma.done.wait (!%p399_p8), %s309_s5, 16  }
 0x116   : > { %521 = vsyncadd (!%p399_p8), %s309_s5, 4294967280  ;;  %p17_p5 = scmp.ge.s32.totalorder %s587_s18, 6   ;;  %s706_s12 = smov %s528_s13 }
 0x117   : > { %s707_s13 = smov %s532_s14  ;;  %s708_s14 = smov %s598_s21 }
 0x118   : > { %s709_s15 = smov %s587_s18  ;;  %19 = sbr.rel (!%p17_p5) target bundleno = 5 (0x5), region = 80 }
 0x11f   :  { %313 = vsyncpa [#allocation3], 1 }
 0x120   :  { %315 = vsyncpa [#allocation3 + $0x1], 1 }
 0x121   :  { %316 = vsyncpa [#allocation5], 1 }
 0x122   :  { %318 = vsyncpa [#allocation5 + $0x1], 1 }

</bundles_post_ra>
